<compile_context>
chip_gen: v7x
topology: tpu7x:2x2x1
jax: 0.10.0
libtpu: 0.0.40
codegen_flags: <defaults>
</compile_context>

<pallas_src>
import functools

import jax
import jax.numpy as jnp
from jax import lax
from jax.experimental import pallas as pl
from jax.experimental.pallas import tpu as pltpu

# Leave ~25% headroom w.r.t. v7x's 64 MiB physical VMEM; also lifts the 16 MiB
# (v5e) / 32 MiB (v6e, v7x) scoped defaults for larger tiles.
_VMEM_LIMIT_BYTES = 48 * 1024 * 1024


# ---------------------------------------------------------------------------
# Kernel 1: dense feature transform   support = x @ W      (tiny, run once)
#   grid = (row tiles,)
# ---------------------------------------------------------------------------
def _dense_matmul_kernel(x_ref, w_ref, out_ref):
    out_ref[...] = jnp.dot(
        x_ref[...], w_ref[...], preferred_element_type=jnp.float32
    ).astype(out_ref.dtype)


def dense_matmul(x, w, *, out_dtype, tile_m=512):
    N, D = x.shape
    H = w.shape[1]
    tm = min(tile_m, N)
    assert N % tm == 0, "N must be divisible by the chosen row tile"
    grid = (N // tm,)

    flops = 2 * N * D * H
    bytes_accessed = (
        N * D * jnp.dtype(x.dtype).itemsize
        + D * H * jnp.dtype(w.dtype).itemsize
        + N * H * jnp.dtype(out_dtype).itemsize
    )

    return pl.pallas_call(
        _dense_matmul_kernel,
        out_shape=jax.ShapeDtypeStruct((N, H), out_dtype),
        grid=grid,
        in_specs=[
            pl.BlockSpec((tm, D), lambda i: (i, 0)),   # x rows
            pl.BlockSpec((D, H), lambda i: (0, 0)),    # weight, fully resident
        ],
        out_specs=pl.BlockSpec((tm, H), lambda i: (i, 0)),
        compiler_params=pltpu.CompilerParams(
            dimension_semantics=("parallel",),
            vmem_limit_bytes=_VMEM_LIMIT_BYTES),
        cost_estimate=pl.CostEstimate(
            flops=flops, transcendentals=0, bytes_accessed=bytes_accessed),
    )(x, w)


# ---------------------------------------------------------------------------
# Kernel 2: neighbour aggregation   out = act(adj @ support)
#   grid = (output row tiles, reduction tiles over adj columns)  — reduction last
#   adj / support arrive in compute_dtype (bf16 by default); accumulation is f32.
# ---------------------------------------------------------------------------
def _spmm_act_kernel(adj_ref, sup_ref, out_ref, acc_ref, *, apply_relu):
    k = pl.program_id(1)

    @pl.when(k == 0)
    def _():
        acc_ref[...] = jnp.zeros_like(acc_ref)

    # (tm, tk) @ (tk, H) -> (tm, H), f32 MXU accumulation
    acc_ref[...] += jnp.dot(adj_ref[...], sup_ref[...],
                            preferred_element_type=jnp.float32)

    @pl.when(k == pl.num_programs(1) - 1)
    def _():
        res = acc_ref[...]
        if apply_relu:
            res = jnp.maximum(res, 0.0)
        out_ref[...] = res.astype(out_ref.dtype)


def spmm_act(adj, support, *, apply_relu, out_dtype, tile_m=512, tile_k=512):
    N = adj.shape[0]
    H = support.shape[1]
    tm = min(tile_m, N)
    tk = min(tile_k, N)
    assert N % tm == 0 and N % tk == 0, "N must be divisible by the chosen tiles"
    grid = (N // tm, N // tk)

    flops = 2 * N * N * H
    bytes_accessed = (
        N * N * jnp.dtype(adj.dtype).itemsize                       # adj once
        + (N // tm) * N * H * jnp.dtype(support.dtype).itemsize     # support per row tile
        + N * H * jnp.dtype(out_dtype).itemsize
    )

    return pl.pallas_call(
        functools.partial(_spmm_act_kernel, apply_relu=apply_relu),
        out_shape=jax.ShapeDtypeStruct((N, H), out_dtype),
        grid=grid,
        in_specs=[
            pl.BlockSpec((tm, tk), lambda i, k: (i, k)),   # adj tile (dominant stream)
            pl.BlockSpec((tk, H), lambda i, k: (k, 0)),    # support k-slab
        ],
        out_specs=pl.BlockSpec((tm, H), lambda i, k: (i, 0)),
        scratch_shapes=[pltpu.VMEM((tm, H), jnp.float32)],
        compiler_params=pltpu.CompilerParams(
            dimension_semantics=("parallel", "arbitrary"),
            vmem_limit_bytes=_VMEM_LIMIT_BYTES),
        cost_estimate=pl.CostEstimate(
            flops=flops, transcendentals=0, bytes_accessed=bytes_accessed),
    )(adj, support)


# ---------------------------------------------------------------------------
# Kernel 3: InnerProductDecoder   a_bar = z @ z.T    (act = identity)
#   grid = (row tiles, col tiles) — lane-dense (tm, tn) output blocks.
#   The "column" operand keeps the whole (N, nz) z resident (tiny) and slices
#   the (tn, nz) rows with pl.ds; contraction via dot_general (no transpose).
# ---------------------------------------------------------------------------
def _inner_product_kernel(zi_ref, zall_ref, out_ref, *, tn):
    j = pl.program_id(1)
    start = pl.multiple_of(j * tn, tn)
    zj = zall_ref[pl.ds(start, tn), :]                       # (tn, nz)
    out_ref[...] = lax.dot_general(
        zi_ref[...], zj,
        dimension_numbers=(((1,), (1,)), ((), ())),          # contract last dims
        preferred_element_type=jnp.float32,
    ).astype(out_ref.dtype)


def inner_product_decoder(z, *, out_dtype, tile_m=512, tile_n=512):
    N, nz = z.shape
    tm = min(tile_m, N)
    tn = min(tile_n, N)
    assert N % tm == 0 and N % tn == 0, "N must be divisible by the chosen tiles"
    grid = (N // tm, N // tn)

    flops = 2 * N * N * nz
    bytes_accessed = (
        2 * N * nz * jnp.dtype(z.dtype).itemsize              # z read as rows + resident copy
        + N * N * jnp.dtype(out_dtype).itemsize                # dominant N^2 write
    )

    return pl.pallas_call(
        functools.partial(_inner_product_kernel, tn=tn),
        out_shape=jax.ShapeDtypeStruct((N, N), out_dtype),
        grid=grid,
        in_specs=[
            pl.BlockSpec((tm, nz), lambda i, j: (i, 0)),       # z rows (output rows)
            pl.BlockSpec((N, nz), lambda i, j: (0, 0)),        # whole z, resident
        ],
        out_specs=pl.BlockSpec((tm, tn), lambda i, j: (i, j)),
        compiler_params=pltpu.CompilerParams(
            dimension_semantics=("parallel", "parallel"),
            vmem_limit_bytes=_VMEM_LIMIT_BYTES),
        cost_estimate=pl.CostEstimate(
            flops=flops, transcendentals=0, bytes_accessed=bytes_accessed),
    )(z, z)


# ---------------------------------------------------------------------------
# Full GAE forward
# ---------------------------------------------------------------------------
def gae_forward(x, adj, params, *, tile_m=512, tile_k=512,
                compute_dtype=jnp.bfloat16, a_bar_dtype=None):
    """Forward pass of the GAE module.

    compute_dtype: dtype fed to the MXU in the bandwidth-bound kernels
      (adj stream, support slabs, decoder z); accumulation stays f32.
    a_bar_dtype:   dtype of the (N, N) reconstruction; pass jnp.bfloat16 to halve
      the dominant HBM write if the loss consumer tolerates it.  Default: x.dtype.
    For v7x megacore keep tile_m <= N/2 so the "parallel" row axis has >= 2 steps.
    """
    w1, w2 = params
    if a_bar_dtype is None:
        a_bar_dtype = x.dtype

    adj_c = adj.astype(compute_dtype)

    # Layer 1: support computed once (hoisted), then adj aggregation + ReLU.
    support1 = dense_matmul(x, w1, out_dtype=compute_dtype, tile_m=tile_m)
    hidden1 = spmm_act(adj_c, support1, apply_relu=True, out_dtype=x.dtype,
                       tile_m=tile_m, tile_k=tile_k)

    # Layer 2 (gz): no activation.
    support2 = dense_matmul(hidden1, w2, out_dtype=compute_dtype, tile_m=tile_m)
    z = spmm_act(adj_c, support2, apply_relu=False, out_dtype=x.dtype,
                 tile_m=tile_m, tile_k=tile_k)

    # Decoder: a_bar = z @ z.T (identity activation).
    a_bar = inner_product_decoder(z.astype(compute_dtype), out_dtype=a_bar_dtype,
                                  tile_m=tile_m, tile_n=tile_m)
    return a_bar, z


def gae_reference(x, adj, params):
    """Plain-JAX reference matching the PyTorch forward (full-precision matmuls)."""
    w1, w2 = params
    hp = lax.Precision.HIGHEST
    hidden1 = jnp.maximum(jnp.dot(adj, jnp.dot(x, w1, precision=hp), precision=hp), 0.0)
    z = jnp.dot(adj, jnp.dot(hidden1, w2, precision=hp), precision=hp)
    a_bar = jnp.dot(z, z.T, precision=hp)
    return a_bar, z


def init_params(key, input_feat_dim, hidden_dim1, n_z, dtype=jnp.float32):
    """Xavier-uniform weights for the two GraphConvolution layers (bias-free)."""
    dims = [(input_feat_dim, hidden_dim1), (hidden_dim1, n_z)]
    params = []
    for fan_in, fan_out in dims:
        key, kw = jax.random.split(key)
        bound = float(jnp.sqrt(6.0 / (fan_in + fan_out)))
        params.append(jax.random.uniform(kw, (fan_in, fan_out), dtype, -bound, bound))
    return params


if __name__ == "__main__":
    # small shapes consistent with the module
    N = 256                  # number of graph nodes
    input_feat_dim = 32
    hidden_dim1 = 64
    n_z = 16
    # tile_m=128 -> 2 steps on every parallel axis (keeps both v7x TCs busy);
    # tile_k=256 -> full-depth contraction slab (MXU depth on v6e/v7x).
    tile_m, tile_k = 128, 256

    key = jax.random.PRNGKey(0)
    key, kx, ka = jax.random.split(key, 3)
    x = jax.random.normal(kx, (N, input_feat_dim), jnp.float32)

    # dense, row-normalized adjacency with self-loops (stand-in for torch.spmm input)
    a = (jax.random.uniform(ka, (N, N)) < 0.05).astype(jnp.float32)
    a = jnp.minimum(a + a.T + jnp.eye(N, dtype=jnp.float32), 1.0)
    adj = a / a.sum(axis=1, keepdims=True)

    params = init_params(key, input_feat_dim, hidden_dim1, n_z)

    a_bar_ref, z_ref = gae_reference(x, adj, params)

    # ---- f32 compute path: must match the HIGHEST-precision reference tightly.
    a_bar32, z32 = gae_forward(x, adj, params, tile_m=tile_m, tile_k=tile_k,
                               compute_dtype=jnp.float32)
    (a_bar32, z32) = jax.block_until_ready((a_bar32, z32))
    assert a_bar32.shape == (N, N) and z32.shape == (N, n_z)
    assert jnp.allclose(z32, z_ref, atol=2e-3, rtol=2e-3), \
        f"z (f32) mismatch, max abs err {float(jnp.max(jnp.abs(z32 - z_ref)))}"
    assert jnp.allclose(a_bar32, a_bar_ref, atol=2e-3, rtol=2e-3), \
        f"a_bar (f32) mismatch, max abs err {float(jnp.max(jnp.abs(a_bar32 - a_bar_ref)))}"

    # ---- default bandwidth-optimized path (bf16 MXU inputs, f32 accumulation):
    # tolerance relaxed to account for bf16 rounding of the MXU inputs.
    a_bar, z = gae_forward(x, adj, params, tile_m=tile_m, tile_k=tile_k)
    (a_bar, z) = jax.block_until_ready((a_bar, z))
    assert a_bar.shape == (N, N) and z.shape == (N, n_z)
    assert jnp.allclose(z, z_ref, atol=2e-2, rtol=2e-2), \
        f"z (bf16 inputs) mismatch, max abs err {float(jnp.max(jnp.abs(z - z_ref)))}"
    assert jnp.allclose(a_bar, a_bar_ref, atol=2e-2, rtol=2e-2), \
        f"a_bar (bf16 inputs) mismatch, max abs err {float(jnp.max(jnp.abs(a_bar - a_bar_ref)))}"

    print("KERNEL_OK")
</pallas_src>

<mosaic_0001>
module attributes {stable_mosaic.version = 11 : i64} {
  func.func @_dense_matmul_kernel(%arg0: i32, %arg1: memref<128x32xf32, #tpu.memory_space<vmem>>, %arg2: memref<32x64xf32, #tpu.memory_space<vmem>>, %arg3: memref<128x64xf32, #tpu.memory_space<vmem>>) attributes {dimension_semantics = [#tpu.dimension_semantics<parallel>], iteration_bounds = array<i64: 2>, scalar_prefetch = 0 : i64, scratch_operands = 0 : i64, tpu.core_type = #tpu.core_type<tc>, window_params = [{transform_indices = @transform_0, window_bounds = array<i64: 128, 32>}, {pipeline_mode = #tpu.pipeline_mode<synchronous>, transform_indices = @transform_1, window_bounds = array<i64: 32, 64>}, {transform_indices = @transform_2, window_bounds = array<i64: 128, 64>}]} {
    %c0 = arith.constant 0 : index
    %c0_0 = arith.constant 0 : index
    %0 = vector.load %arg1[%c0, %c0_0] : memref<128x32xf32, #tpu.memory_space<vmem>>, vector<128x32xf32>
    %c0_1 = arith.constant 0 : index
    %c0_2 = arith.constant 0 : index
    %1 = vector.load %arg2[%c0_1, %c0_2] : memref<32x64xf32, #tpu.memory_space<vmem>>, vector<32x64xf32>
    %cst = arith.constant dense<0.000000e+00> : vector<128x64xf32>
    %2 = tpu.matmul %0, %1, %cst {dimension_numbers = #tpu.dot_dimension_numbers<[1], [0], [0], [1], [0, 0, 1, 1], [], []>} : vector<128x32xf32>, vector<32x64xf32>, vector<128x64xf32> -> vector<128x64xf32>
    %c0_3 = arith.constant 0 : index
    %c0_4 = arith.constant 0 : index
    %3 = vector.load %arg3[%c0_3, %c0_4] : memref<128x64xf32, #tpu.memory_space<vmem>>, vector<128x64xf32>
    tpu.vector_store %arg3[%c0_3, %c0_4], %2 {strides = array<i32>} : memref<128x64xf32, #tpu.memory_space<vmem>>, vector<128x64xf32>,
    return
  }
  func.func @transform_0(%arg0: i32) -> (i32, i32) {
    %c0_i32 = arith.constant 0 : i32
    %c0_i32_0 = arith.constant 0 : i32
    return %arg0, %c0_i32 : i32, i32
  }
  func.func @transform_1(%arg0: i32) -> (i32, i32) {
    %c0_i32 = arith.constant 0 : i32
    %c0_i32_0 = arith.constant 0 : i32
    %c0_i32_1 = arith.constant 0 : i32
    return %c0_i32, %c0_i32_0 : i32, i32
  }
  func.func @transform_2(%arg0: i32) -> (i32, i32) {
    %c0_i32 = arith.constant 0 : i32
    %c0_i32_0 = arith.constant 0 : i32
    return %arg0, %c0_i32 : i32, i32
  }
}

</mosaic_0001>

<bundles_post_ra>
// kernel: tpu_custom_call.1
= control target key start
LH: loop header
LB: loop body
LE: loop exit
PB: predicated region body
PF: predicated region fallthrough
CT: control target
= control target key end

     0   :  { %s556_s9 = smov 0   ;;  %s660_s0 = inlined_call_operand.vmem [shape: f32[256,32], index: 0, kind: input, shape index: {}]   ;;  %s661_s1 = inlined_call_operand.vmem [shape: f32[32,64], index: 1, kind: input, shape index: {}]   ;;  %s662_s2 = inlined_call_operand.vmem [shape: f32[256,64], index: 2, kind: output, shape index: {}]  }
   0x1 LB: > { %s434_s10 = sadd.s32 4294967295, %s539_s9   ;;  %p438_p0 = scmp.ge.s32.totalorder %s539_s9, 1  ;;  %s539_s9 = sphi %s556_s9, %s12_s9  }
   0x2   : > { %p113_p1 = scmp.lt.s32.totalorder %s539_s9, 3 }
   0x4   : > { %p114_p2 = pnand %p438_p0, %p113_p1 }
   0x5   : > { %v163_v0 = vld [vmem:[%s661_s1] sm:$0xff] (!%p114_p2)  ;;  %v164_v1 = vld [vmem:[%s661_s1 + $0x8] sm:$0xff] (!%p114_p2)  ;;  %v165_v2 = vld [vmem:[%s661_s1 + $0x10] sm:$0xff] (!%p114_p2)  ;;  %s439_s17 = sshll.u32 (!%p114_p2), %s434_s10, 4  ;;  %vm167_vm0 = vcmask (!%p114_p2), 261120   ;;  %vm361_vm1 = vcmask (!%p114_p2), 523264  }
   0x6   : > { %117 = sbr.rel (%p114_p2) target bundleno = 245 (0xf5), region = 28  ;;  %v513_v3 = vpack.c.bf16 (!%p114_p2), %v164_v1, %v163_v0  ;;  %v166_v4 = vld [vmem:[%s661_s1 + $0x18] sm:$0xff] (!%p114_p2)  ;;  %p136_p3 = scmp.lt.s32.totalorder (!%p114_p2), %s439_s17, 31 }
   0x7   : > { %v517_v5 = vpack.c.bf16 (!%p114_p2), %v166_v4, %v165_v2 }
   0x8   : > { %514 = vmatprep.subr.bf16.mxu0 (!%p114_p2), %v513_v3  ;;  %521 = vmatprep.subr.bf16.mxu1 (!%p114_p2), %v513_v3 }
   0x9   : > { %516 = vmatpush3.bf16.msra.mxu0 (!%p114_p2), %v513_v3  ;;  %523 = vmatpush3.bf16.msra.mxu1 (!%p114_p2), %v513_v3 }
   0xa   : > { %518 = vmatprep.subr.bf16.mxu0 (!%p114_p2), %v517_v5  ;;  %522 = vmatprep.subr.bf16.mxu1 (!%p114_p2), %v517_v5 }
   0xd   : > { %s664_s17 = smov (!%p136_p3, %s439_s17), 31  ;;  %520 = vmatpush3.bf16.msra.mxu0 %v517_v5  ;;  %524 = vmatpush3.bf16.msra.mxu1 %v517_v5 }
   0xe   : > { %s440_s20 = sshll.u32 %s664_s17, 3 }
   0xf   : > { %s584_s23 = scalar_lea.vmem %s660_s0, %s440_s20  ;;  %s623_s26 = scalar_lea.vmem %s662_s2, %s440_s20 }
  0x10   : > { %v147_v6 = vld [vmem:[%s584_s23] sm:$0xff]  ;;  %v148_v8 = vld [vmem:[%s584_s23 + $0x8] sm:$0xff]  ;;  %v149_v10 = vld [vmem:[%s584_s23 + $0x10] sm:$0xff] }
  0x11   : > { %v155_v7 = vld [vmem:[%s584_s23 + $0x40] sm:$0xff]  ;;  %v156_v9 = vld [vmem:[%s584_s23 + $0x48] sm:$0xff]  ;;  %489 = vmatprep.mubr.msk.f32.mxu0 %vm167_vm0, %v147_v6  ;;  %v157_v11 = vld [vmem:[%s584_s23 + $0x50] sm:$0xff] }
  0x12   : > { %501 = vmatprep.mubr.msk.f32.mxu1 %vm167_vm0, %v155_v7  ;;  %490 = vmatmul.mubr.msk.f32.vlgmr.msra.gmra.mrb[0].mxu0 %vm167_vm0, %v148_v8  ;;  %v150_v12 = vld [vmem:[%s584_s23 + $0x18] sm:$0xff]  ;;  %v151_v14 = vld [vmem:[%s584_s23 + $0x20] sm:$0xff]  ;;  %v152_v16 = vld [vmem:[%s584_s23 + $0x28] sm:$0xff] }
  0x13   : > { %502 = vmatmul.mubr.msk.f32.vlgmr.msra.gmra.mrb[0].mxu1 %vm167_vm0, %v156_v9  ;;  %492 = vmatprep.mubr.msk.f32.mxu0 %vm167_vm0, %v149_v10  ;;  %v158_v13 = vld [vmem:[%s584_s23 + $0x58] sm:$0xff]  ;;  %v159_v15 = vld [vmem:[%s584_s23 + $0x60] sm:$0xff]  ;;  %v160_v17 = vld [vmem:[%s584_s23 + $0x68] sm:$0xff] }
  0x14   : > { %504 = vmatprep.mubr.msk.f32.mxu1 %vm167_vm0, %v157_v11  ;;  %v153_v18 = vld [vmem:[%s584_s23 + $0x30] sm:$0xff]  ;;  %v154_v20 = vld [vmem:[%s584_s23 + $0x38] sm:$0xff] }
  0x15   : > { %v161_v19 = vld [vmem:[%s584_s23 + $0x70] sm:$0xff]  ;;  %v162_v21 = vld [vmem:[%s584_s23 + $0x78] sm:$0xff] }
  0x16   : > { %493 = vmatmul.mubr.msk.f32.gmra.mrb[2].mxu0 %vm167_vm0, %v150_v12 }
  0x17   : > { %505 = vmatmul.mubr.msk.f32.gmra.mrb[2].mxu1 %vm167_vm0, %v158_v13  ;;  %495 = vmatprep.mubr.msk.f32.mxu0 %vm167_vm0, %v151_v14 }
  0x18   : > { %507 = vmatprep.mubr.msk.f32.mxu1 %vm167_vm0, %v159_v15 }
  0x1a   : > { %496 = vmatmul.mubr.msk.f32.gmra.mrb[4].mxu0 %vm167_vm0, %v152_v16 }
  0x1b   : > { %508 = vmatmul.mubr.msk.f32.gmra.mrb[4].mxu1 %vm167_vm0, %v160_v17  ;;  %498 = vmatprep.mubr.msk.f32.mxu0 %vm167_vm0, %v153_v18 }
  0x1c   : > { %510 = vmatprep.mubr.msk.f32.mxu1 %vm167_vm0, %v161_v19 }
  0x1e   : > { %499 = vmatmul.mubr.msk.f32.gmra.mrb[6].mxu0 %vm167_vm0, %v154_v20 }
  0x1f   : > { %511 = vmatmul.mubr.msk.f32.gmra.mrb[6].mxu1 %vm167_vm0, %v162_v21 }
  0xe5   : > { %v491_v22 = vpop.f32.mrb[0].mxu0 }
  0xe6   : > { %v503_v23 = vpop.f32.mrb[0].mxu1  ;;  %363 = vst.msk [vmem:[%s623_s26 + $0x8] sm:$0xff] %vm361_vm1, %v491_v22  ;;  %v282_v24 = vpop.f32.mrb[1].mxu0 }
  0xe7   : > { %371 = vst.msk [vmem:[%s623_s26 + $0x48] sm:$0xff] %vm361_vm1, %v503_v23  ;;  %v322_v25 = vpop.f32.mrb[1].mxu1  ;;  %362 = vst.msk [vmem:[%s623_s26] sm:$0xff] %vm361_vm1, %v282_v24 }
  0xe8   : > { %370 = vst.msk [vmem:[%s623_s26 + $0x40] sm:$0xff] %vm361_vm1, %v322_v25 }
  0xe9   : > { %v494_v26 = vpop.f32.mrb[2].mxu0 }
  0xea   : > { %v506_v27 = vpop.f32.mrb[2].mxu1  ;;  %365 = vst.msk [vmem:[%s623_s26 + $0x18] sm:$0xff] %vm361_vm1, %v494_v26  ;;  %v292_v28 = vpop.f32.mrb[3].mxu0 }
  0xeb   : > { %373 = vst.msk [vmem:[%s623_s26 + $0x58] sm:$0xff] %vm361_vm1, %v506_v27  ;;  %v332_v29 = vpop.f32.mrb[3].mxu1  ;;  %364 = vst.msk [vmem:[%s623_s26 + $0x10] sm:$0xff] %vm361_vm1, %v292_v28 }
  0xec   : > { %372 = vst.msk [vmem:[%s623_s26 + $0x50] sm:$0xff] %vm361_vm1, %v332_v29 }
  0xed   : > { %v497_v30 = vpop.f32.mrb[4].mxu0 }
  0xee   : > { %v509_v31 = vpop.f32.mrb[4].mxu1  ;;  %367 = vst.msk [vmem:[%s623_s26 + $0x28] sm:$0xff] %vm361_vm1, %v497_v30  ;;  %v302_v32 = vpop.f32.mrb[5].mxu0 }
  0xef   : > { %375 = vst.msk [vmem:[%s623_s26 + $0x68] sm:$0xff] %vm361_vm1, %v509_v31  ;;  %v342_v33 = vpop.f32.mrb[5].mxu1  ;;  %366 = vst.msk [vmem:[%s623_s26 + $0x20] sm:$0xff] %vm361_vm1, %v302_v32 }
  0xf0   : > { %374 = vst.msk [vmem:[%s623_s26 + $0x60] sm:$0xff] %vm361_vm1, %v342_v33 }
  0xf1   : > { %v500_v34 = vpop.f32.mrb[6].mxu0 }
  0xf2   : > { %v512_v35 = vpop.f32.mrb[6].mxu1  ;;  %369 = vst.msk [vmem:[%s623_s26 + $0x38] sm:$0xff] %vm361_vm1, %v500_v34  ;;  %v312_v36 = vpop.f32.mrb[7].mxu0 }
  0xf3   : > { %377 = vst.msk [vmem:[%s623_s26 + $0x78] sm:$0xff] %vm361_vm1, %v512_v35  ;;  %v352_v37 = vpop.f32.mrb[7].mxu1  ;;  %368 = vst.msk [vmem:[%s623_s26 + $0x30] sm:$0xff] %vm361_vm1, %v312_v36 }
  0xf4   : > { %376 = vst.msk [vmem:[%s623_s26 + $0x70] sm:$0xff] %vm361_vm1, %v352_v37 }
  0xf5 PF: > { %s12_s9 = sadd.s32 1, %s539_s9  }
  0xf6   : > { %p9_p4 = scmp.ge.s32.totalorder %s12_s9, 4  }
  0xf8   :  { %11 = sbr.rel (!%p9_p4) target bundleno = 1 (0x1), region = 58 }

</bundles_post_ra>
